<compile_context>
chip_gen: v7x
topology: tpu7x:2x2x1
jax: 0.10.0
libtpu: 0.0.40
codegen_flags: <defaults>
</compile_context>

<pallas_src>
import functools

import jax
import jax.numpy as jnp
from jax.experimental import pallas as pl
from jax.experimental.pallas import tpu as pltpu


def _round_up(a, b):
    return (a + b - 1) // b * b


def _vmem_capacity_bytes():
    """Per-core VMEM capacity; conservative v7x fallback if the query fails."""
    try:
        return int(pltpu.get_tpu_info().vmem_capacity_bytes)
    except Exception:
        return 64 << 20


def _silu(h):
    # exp and the approximate reciprocal both run on the EUP slot, which is
    # otherwise idle while the MXU streams -> (nearly) free, unlike
    # jax.nn.sigmoid's VALU divide chain.
    return h * pl.reciprocal(1.0 + jnp.exp(-h), approx=True)


# ---------------------------------------------------------------------------
# Path A: weights fully resident in VMEM (single-buffered), grid over row tiles.
# ---------------------------------------------------------------------------
def _ff_kernel_resident(x_ref, w1_ref, b1_ref, w2_ref, b2_ref, o_ref, *,
                        eps, cdtype):
    xf = x_ref[...].astype(jnp.float32)

    # LayerNorm statistics (gamma/beta folded into W1/b1 on the host).
    mu = jnp.mean(xf, axis=-1, keepdims=True)
    xc = xf - mu
    var = jnp.mean(xc * xc, axis=-1, keepdims=True)
    xn = (xc * jax.lax.rsqrt(var + eps)).astype(cdtype)

    # Linear1 (D -> H) on the MXU, f32 accumulation, + SiLU.
    h = jnp.dot(xn, w1_ref[...], preferred_element_type=jnp.float32)
    h = _silu(h + b1_ref[...].astype(jnp.float32))

    # TODO(synk): training-mode dropout (pltpu.prng_random_bits) not included;
    # dropout is identity in eval/inference mode.

    # Linear2 (H -> D) on the MXU, f32 accumulation, + bias + residual.
    y = jnp.dot(h.astype(cdtype), w2_ref[...], preferred_element_type=jnp.float32)
    y = y + b2_ref[...].astype(jnp.float32)

    # Re-read the residual from the already-resident input tile (keeps xf's
    # live range short -> less spill pressure).
    o_ref[...] = (y + x_ref[...].astype(jnp.float32)).astype(o_ref.dtype)


# ---------------------------------------------------------------------------
# Path B: hidden dimension tiled.  Grid = (row tiles [parallel], H chunks
# [arbitrary]); the (tm, D) f32 accumulator lives in scratch, initialized at
# the first H chunk and finalized (bias + residual + store) at the last one.
# ---------------------------------------------------------------------------
def _ff_kernel_htiled(x_ref, w1_ref, b1_ref, w2_ref, b2_ref, o_ref, acc_ref, *,
                      eps, cdtype):
    hi = pl.program_id(1)

    @pl.when(hi == 0)
    def _():
        acc_ref[...] = jnp.zeros_like(acc_ref)

    xf = x_ref[...].astype(jnp.float32)
    mu = jnp.mean(xf, axis=-1, keepdims=True)
    xc = xf - mu
    var = jnp.mean(xc * xc, axis=-1, keepdims=True)
    xn = (xc * jax.lax.rsqrt(var + eps)).astype(cdtype)

    h = jnp.dot(xn, w1_ref[...], preferred_element_type=jnp.float32)
    h = _silu(h + b1_ref[...].astype(jnp.float32))

    # TODO(synk): training-mode dropout not included (identity in eval mode).

    acc_ref[...] += jnp.dot(h.astype(cdtype), w2_ref[...],
                            preferred_element_type=jnp.float32)

    @pl.when(hi == pl.num_programs(1) - 1)
    def _():
        y = acc_ref[...] + b2_ref[...].astype(jnp.float32)
        o_ref[...] = (y + x_ref[...].astype(jnp.float32)).astype(o_ref.dtype)


def feed_forward_module(x, gamma, beta, w1, b1, w2, b2, *,
                        eps=1e-5, tm=256, compute_dtype=jnp.bfloat16,
                        force_h_tiling=False, h_tile=None):
    """x: (B, T, d_model). Weights stored as (in_features, out_features).

    Returns the same shape/dtype as x.
    """
    B, T, D = x.shape
    H = w1.shape[1]
    M = B * T

    xbytes = jnp.dtype(x.dtype).itemsize
    wbytes = jnp.dtype(compute_dtype).itemsize

    # --- Host-side weight prep (done once; exact algebra) --------------------
    # (xhat*gamma + beta) @ W1 + b1 == xhat @ (diag(gamma) @ W1) + (beta @ W1 + b1)
    w1_f32 = w1.astype(jnp.float32)
    w1_fold = gamma.astype(jnp.float32)[:, None] * w1_f32
    b1_fold = beta.astype(jnp.float32) @ w1_f32 + b1.astype(jnp.float32)

    w1_c = w1_fold.astype(compute_dtype)             # (D, H)
    w2_c = w2.astype(compute_dtype)                  # (H, D)
    b1_2 = b1_fold.reshape(1, H).astype(jnp.float32)
    b2_2 = b2.reshape(1, D).astype(jnp.float32)

    # --- Row tiling (no host-side pad: Pallas masks the ragged last block) ---
    tm = max(8, min(tm, _round_up(M, 8)))
    if M > 8:
        # Keep >= 2 row tiles so the "parallel" axis shards across both v7x TCs.
        tm = min(tm, _round_up(-(-M // 2), 8))

    capacity = _vmem_capacity_bytes()
    budget = int(0.85 * capacity)

    x2d = x.reshape(M, D)

    cost = pl.CostEstimate(
        flops=4 * M * D * H,
        transcendentals=M * H,
        bytes_accessed=M * D * 2 * xbytes + 2 * D * H * wbytes + (H + D) * 4)

    kernel_kw = dict(eps=eps, cdtype=compute_dtype)

    def resident_need(tm_):
        return (2 * tm_ * D * xbytes          # double-buffered input row tile
                + 2 * tm_ * D * xbytes        # double-buffered output row tile
                + 2 * D * H * wbytes          # resident weights (1 buffer)
                + (H + D) * 4                 # biases (f32)
                + 2 * tm_ * D * 4             # xn / y f32 temporaries
                + tm_ * H * (4 + 4 + 2))      # h f32, sigmoid temp, h bf16

    use_resident = ((not force_h_tiling) and (h_tile is None)
                    and resident_need(tm) + (4 << 20) <= budget)

    if use_resident:
        grid_m = pl.cdiv(M, tm)
        need = resident_need(tm)
        vmem_limit = int(min(max(need + (8 << 20), 32 << 20), budget))
        resident = dict(pipeline_mode=pl.Buffered(1))   # constant blocks
        out2d = pl.pallas_call(
            functools.partial(_ff_kernel_resident, **kernel_kw),
            out_shape=jax.ShapeDtypeStruct((M, D), x.dtype),
            grid_spec=pltpu.PrefetchScalarGridSpec(
                num_scalar_prefetch=0,
                grid=(grid_m,),
                in_specs=[
                    pl.BlockSpec((tm, D), lambda i: (i, 0)),              # x rows
                    pl.BlockSpec((D, H), lambda i: (0, 0), **resident),   # W1'
                    pl.BlockSpec((1, H), lambda i: (0, 0), **resident),   # b1'
                    pl.BlockSpec((H, D), lambda i: (0, 0), **resident),   # W2
                    pl.BlockSpec((1, D), lambda i: (0, 0), **resident),   # b2
                ],
                out_specs=pl.BlockSpec((tm, D), lambda i: (i, 0)),
            ),
            compiler_params=pltpu.CompilerParams(
                dimension_semantics=("parallel",),
                vmem_limit_bytes=vmem_limit),
            cost_estimate=cost,
        )(x2d, w1_c, b1_2, w2_c, b2_2)
        return out2d.reshape(B, T, D)

    # ------------------------------ H-tiled path -----------------------------
    Hp = _round_up(H, 128)

    def htiled_need(tm_, th_):
        return (2 * tm_ * D * xbytes
                + 2 * tm_ * D * xbytes
                + 2 * 2 * D * th_ * wbytes    # W1/W2 chunks, double-buffered
                + 2 * (th_ + D) * 4           # bias chunks
                + tm_ * D * 4                 # f32 accumulator scratch
                + 2 * tm_ * D * 4             # xn / y temporaries
                + tm_ * th_ * (4 + 4 + 2))    # h f32, sigmoid temp, h bf16

    if h_tile is not None:
        th = int(h_tile)
        assert th % 128 == 0 and Hp % th == 0, \
            "h_tile must be a multiple of 128 that divides the (padded) hidden dim"
    else:
        th = 128
        found = False
        for tm_c in sorted({tm, 256, 128, 64, 32, 16, 8}, reverse=True):
            if tm_c > tm or tm_c < 8:
                continue
            for th_c in range((min(Hp, 4096) // 128) * 128, 0, -128):
                if Hp % th_c:
                    continue
                if htiled_need(tm_c, th_c) + (4 << 20) <= budget:
                    tm, th = tm_c, th_c
                    found = True
                    break
            if found:
                break

    grid_m = pl.cdiv(M, tm)

    if Hp != H:
        # Zero padding is exact: padded W1 cols give h=0 and padded W2 rows
        # contribute nothing to the accumulator.
        w1_c = jnp.pad(w1_c, ((0, 0), (0, Hp - H)))
        b1_2 = jnp.pad(b1_2, ((0, 0), (0, Hp - H)))
        w2_c = jnp.pad(w2_c, ((0, Hp - H), (0, 0)))

    need = htiled_need(tm, th)
    vmem_limit = int(min(max(need + (8 << 20), 32 << 20), budget))

    out2d = pl.pallas_call(
        functools.partial(_ff_kernel_htiled, **kernel_kw),
        out_shape=jax.ShapeDtypeStruct((M, D), x.dtype),
        grid_spec=pltpu.PrefetchScalarGridSpec(
            num_scalar_prefetch=0,
            grid=(grid_m, Hp // th),
            in_specs=[
                pl.BlockSpec((tm, D), lambda i, j: (i, 0)),    # x rows (reused across j)
                pl.BlockSpec((D, th), lambda i, j: (0, j)),    # W1' chunk
                pl.BlockSpec((1, th), lambda i, j: (0, j)),    # b1' chunk
                pl.BlockSpec((th, D), lambda i, j: (j, 0)),    # W2 chunk
                pl.BlockSpec((1, D), lambda i, j: (0, 0),
                             pipeline_mode=pl.Buffered(1)),    # b2 (constant)
            ],
            out_specs=pl.BlockSpec((tm, D), lambda i, j: (i, 0)),
            scratch_shapes=[pltpu.VMEM((tm, D), jnp.float32)],
        ),
        compiler_params=pltpu.CompilerParams(
            dimension_semantics=("parallel", "arbitrary"),
            vmem_limit_bytes=vmem_limit),
        cost_estimate=cost,
    )(x2d, w1_c, b1_2, w2_c, b2_2)
    return out2d.reshape(B, T, D)


def _reference(x, gamma, beta, w1, b1, w2, b2, eps=1e-5):
    xf = x.astype(jnp.float32)
    mu = jnp.mean(xf, axis=-1, keepdims=True)
    var = jnp.mean((xf - mu) ** 2, axis=-1, keepdims=True)
    xn = (xf - mu) / jnp.sqrt(var + eps) * gamma + beta
    h = xn @ w1 + b1
    h = h * jax.nn.sigmoid(h)
    y = h @ w2 + b2
    return (y + xf).astype(x.dtype)


if __name__ == "__main__":
    # Small shapes consistent with the module: batch=2, seq=8, d_module=128,
    # expansion_factor=4 -> hidden=512 (lane-dense feature dims).
    B, T, D, EXP = 2, 8, 128, 4
    H = D * EXP

    key = jax.random.PRNGKey(0)
    kx, kg, kb, kw1, kb1, kw2, kb2, kx2 = jax.random.split(key, 8)

    x = jax.random.normal(kx, (B, T, D), dtype=jnp.float32)

    gamma = jnp.ones((D,), jnp.float32) + 0.01 * jax.random.normal(kg, (D,))
    beta = 0.01 * jax.random.normal(kb, (D,))
    w1 = jax.random.normal(kw1, (D, H), dtype=jnp.float32) / jnp.sqrt(D)
    b1 = 0.01 * jax.random.normal(kb1, (H,))
    w2 = jax.random.normal(kw2, (H, D), dtype=jnp.float32) / jnp.sqrt(H)
    b2 = 0.01 * jax.random.normal(kb2, (D,))

    ref = _reference(x, gamma, beta, w1, b1, w2, b2)

    # Path A: resident weights.
    out = jax.block_until_ready(feed_forward_module(x, gamma, beta, w1, b1, w2, b2))
    assert out.shape == x.shape and out.dtype == x.dtype
    assert jnp.allclose(out, ref, atol=5e-2, rtol=5e-2), "resident path mismatch"

    # Path B: H-tiled accumulator path (forced, 2 hidden chunks).
    out_ht = jax.block_until_ready(
        feed_forward_module(x, gamma, beta, w1, b1, w2, b2, h_tile=256))
    assert jnp.allclose(out_ht, ref, atol=5e-2, rtol=5e-2), "H-tiled path mismatch"

    # Ragged row count (M not a multiple of tm): exercises masked last block.
    xr = jax.random.normal(kx2, (3, 10, D), dtype=jnp.float32)
    ref_r = _reference(xr, gamma, beta, w1, b1, w2, b2)
    out_r = jax.block_until_ready(feed_forward_module(xr, gamma, beta, w1, b1, w2, b2))
    assert out_r.shape == xr.shape
    assert jnp.allclose(out_r, ref_r, atol=5e-2, rtol=5e-2), "ragged path mismatch"

    print("KERNEL_OK")
</pallas_src>

<mosaic_0001>
module attributes {stable_mosaic.version = 11 : i64} {
  func.func @_ff_kernel_resident(%arg0: i32, %arg1: memref<8x128xf32, #tpu.memory_space<vmem>>, %arg2: memref<128x512xbf16, #tpu.memory_space<vmem>>, %arg3: memref<1x512xf32, #tpu.memory_space<vmem>>, %arg4: memref<512x128xbf16, #tpu.memory_space<vmem>>, %arg5: memref<1x128xf32, #tpu.memory_space<vmem>>, %arg6: memref<8x128xf32, #tpu.memory_space<vmem>>) attributes {dimension_semantics = [#tpu.dimension_semantics<parallel>], iteration_bounds = array<i64: 2>, scalar_prefetch = 0 : i64, scratch_operands = 0 : i64, tpu.core_type = #tpu.core_type<tc>, window_params = [{transform_indices = @transform_0, window_bounds = array<i64: 8, 128>}, {pipeline_mode = #tpu.pipeline_mode<synchronous>, transform_indices = @transform_1, window_bounds = array<i64: 128, 512>}, {pipeline_mode = #tpu.pipeline_mode<synchronous>, transform_indices = @transform_2, window_bounds = array<i64: 1, 512>}, {pipeline_mode = #tpu.pipeline_mode<synchronous>, transform_indices = @transform_3, window_bounds = array<i64: 512, 128>}, {pipeline_mode = #tpu.pipeline_mode<synchronous>, transform_indices = @transform_4, window_bounds = array<i64: 1, 128>}, {transform_indices = @transform_5, window_bounds = array<i64: 8, 128>}]} {
    %c0 = arith.constant 0 : index
    %c0_0 = arith.constant 0 : index
    %0 = vector.load %arg1[%c0, %c0_0] : memref<8x128xf32, #tpu.memory_space<vmem>>, vector<8x128xf32>
    %cst = arith.constant dense<0.000000e+00> : vector<8xf32>
    %1 = vector.multi_reduction <add>, %0, %cst [1] : vector<8x128xf32> to vector<8xf32>
    %2 = vector.shape_cast %1 : vector<8xf32> to vector<8x1xf32>
    %cst_1 = arith.constant 1.280000e+02 : f32
    %3 = vector.broadcast %cst_1 : f32 to vector<8x1xf32>
    %4 = arith.divf %2, %3 : vector<8x1xf32>
    %5 = vector.broadcast %4 : vector<8x1xf32> to vector<8x128xf32>
    %6 = arith.subf %0, %5 : vector<8x128xf32>
    %7 = arith.mulf %6, %6 : vector<8x128xf32>
    %cst_2 = arith.constant dense<0.000000e+00> : vector<8xf32>
    %8 = vector.multi_reduction <add>, %7, %cst_2 [1] : vector<8x128xf32> to vector<8xf32>
    %9 = vector.shape_cast %8 : vector<8xf32> to vector<8x1xf32>
    %cst_3 = arith.constant 1.280000e+02 : f32
    %10 = vector.broadcast %cst_3 : f32 to vector<8x1xf32>
    %11 = arith.divf %9, %10 : vector<8x1xf32>
    %cst_4 = arith.constant 9.99999974E-6 : f32
    %12 = vector.broadcast %cst_4 : f32 to vector<8x1xf32>
    %13 = arith.addf %11, %12 : vector<8x1xf32>
    %14 = math.rsqrt %13 : vector<8x1xf32>
    %15 = vector.broadcast %14 : vector<8x1xf32> to vector<8x128xf32>
    %16 = arith.mulf %6, %15 : vector<8x128xf32>
    %17 = arith.truncf %16 : vector<8x128xf32> to vector<8x128xbf16>
    %c0_5 = arith.constant 0 : index
    %c0_6 = arith.constant 0 : index
    %18 = vector.load %arg2[%c0_5, %c0_6] : memref<128x512xbf16, #tpu.memory_space<vmem>>, vector<128x512xbf16>
    %cst_7 = arith.constant dense<0.000000e+00> : vector<8x512xf32>
    %19 = tpu.matmul %17, %18, %cst_7 {dimension_numbers = #tpu.dot_dimension_numbers<[1], [0], [0], [1], [0, 0, 1, 1], [], []>} : vector<8x128xbf16>, vector<128x512xbf16>, vector<8x512xf32> -> vector<8x512xf32>
    %c0_8 = arith.constant 0 : index
    %c0_9 = arith.constant 0 : index
    %20 = vector.load %arg3[%c0_8, %c0_9] : memref<1x512xf32, #tpu.memory_space<vmem>>, vector<1x512xf32>
    %21 = vector.broadcast %20 : vector<1x512xf32> to vector<8x512xf32>
    %22 = arith.addf %19, %21 : vector<8x512xf32>
    %cst_10 = arith.constant 0.000000e+00 : f32
    %23 = vector.broadcast %cst_10 : f32 to vector<8x512xf32>
    %24 = arith.subf %23, %22 : vector<8x512xf32>
    %25 = math.exp %24 : vector<8x512xf32>
    %cst_11 = arith.constant 1.000000e+00 : f32
    %26 = vector.broadcast %cst_11 : f32 to vector<8x512xf32>
    %27 = arith.addf %26, %25 : vector<8x512xf32>
    %28 = tpu.reciprocal %27 {approx = true} : vector<8x512xf32> -> vector<8x512xf32>
    %29 = arith.mulf %22, %28 : vector<8x512xf32>
    %30 = arith.truncf %29 : vector<8x512xf32> to vector<8x512xbf16>
    %c0_12 = arith.constant 0 : index
    %c0_13 = arith.constant 0 : index
    %31 = vector.load %arg4[%c0_12, %c0_13] : memref<512x128xbf16, #tpu.memory_space<vmem>>, vector<512x128xbf16>
    %cst_14 = arith.constant dense<0.000000e+00> : vector<8x128xf32>
    %32 = tpu.matmul %30, %31, %cst_14 {dimension_numbers = #tpu.dot_dimension_numbers<[1], [0], [0], [1], [0, 0, 1, 1], [], []>} : vector<8x512xbf16>, vector<512x128xbf16>, vector<8x128xf32> -> vector<8x128xf32>
    %c0_15 = arith.constant 0 : index
    %c0_16 = arith.constant 0 : index
    %33 = vector.load %arg5[%c0_15, %c0_16] : memref<1x128xf32, #tpu.memory_space<vmem>>, vector<1x128xf32>
    %34 = vector.broadcast %33 : vector<1x128xf32> to vector<8x128xf32>
    %35 = arith.addf %32, %34 : vector<8x128xf32>
    %c0_17 = arith.constant 0 : index
    %c0_18 = arith.constant 0 : index
    %36 = vector.load %arg1[%c0_17, %c0_18] : memref<8x128xf32, #tpu.memory_space<vmem>>, vector<8x128xf32>
    %37 = arith.addf %35, %36 : vector<8x128xf32>
    %c0_19 = arith.constant 0 : index
    %c0_20 = arith.constant 0 : index
    %38 = vector.load %arg6[%c0_19, %c0_20] : memref<8x128xf32, #tpu.memory_space<vmem>>, vector<8x128xf32>
    tpu.vector_store %arg6[%c0_19, %c0_20], %37 {strides = array<i32>} : memref<8x128xf32, #tpu.memory_space<vmem>>, vector<8x128xf32>,
    return
  }
  func.func @transform_0(%arg0: i32) -> (i32, i32) {
    %c0_i32 = arith.constant 0 : i32
    %c0_i32_0 = arith.constant 0 : i32
    return %arg0, %c0_i32 : i32, i32
  }
  func.func @transform_1(%arg0: i32) -> (i32, i32) {
    %c0_i32 = arith.constant 0 : i32
    %c0_i32_0 = arith.constant 0 : i32
    %c0_i32_1 = arith.constant 0 : i32
    return %c0_i32, %c0_i32_0 : i32, i32
  }
  func.func @transform_2(%arg0: i32) -> (i32, i32) {
    %c0_i32 = arith.constant 0 : i32
    %c0_i32_0 = arith.constant 0 : i32
    %c0_i32_1 = arith.constant 0 : i32
    return %c0_i32, %c0_i32_0 : i32, i32
  }
  func.func @transform_3(%arg0: i32) -> (i32, i32) {
    %c0_i32 = arith.constant 0 : i32
    %c0_i32_0 = arith.constant 0 : i32
    %c0_i32_1 = arith.constant 0 : i32
    return %c0_i32, %c0_i32_0 : i32, i32
  }
  func.func @transform_4(%arg0: i32) -> (i32, i32) {
    %c0_i32 = arith.constant 0 : i32
    %c0_i32_0 = arith.constant 0 : i32
    %c0_i32_1 = arith.constant 0 : i32
    return %c0_i32, %c0_i32_0 : i32, i32
  }
  func.func @transform_5(%arg0: i32) -> (i32, i32) {
    %c0_i32 = arith.constant 0 : i32
    %c0_i32_0 = arith.constant 0 : i32
    return %arg0, %c0_i32 : i32, i32
  }
}

</mosaic_0001>

<bundles_post_ra>
// kernel: tpu_custom_call.1
= control target key start
LH: loop header
LB: loop body
LE: loop exit
PB: predicated region body
PF: predicated region fallthrough
CT: control target
= control target key end

     0   :  { %10 = vsyncpa [#allocation3], 0  ;;  %s1792_s0 = inlined_call_operand.hbm [shape: f32[16,128], index: 0, kind: input, shape index: {}]   ;;  %s1793_s1 = inlined_call_operand.hbm [shape: bf16[128,512], index: 1, kind: input, shape index: {}]   ;;  %s1794_s2 = inlined_call_operand.vmem [shape: f32[1,512], index: 2, kind: input, shape index: {}]   ;;  %s1795_s3 = inlined_call_operand.hbm [shape: bf16[512,128], index: 3, kind: input, shape index: {}]   ;;  %s1796_s4 = inlined_call_operand.vmem [shape: f32[1,128], index: 4, kind: input, shape index: {}]   ;;  %s1797_s5 = inlined_call_operand.hbm [shape: f32[16,128], index: 5, kind: output, shape index: {}]  }
   0x1   :  { %12 = vsyncpa [#allocation3 + $0x1], 0 }
   0x2   :  { %13 = vsyncpa [#allocation6], 0 }
   0x3   :  { %14 = vsyncpa [#allocation4], 0 }
   0x4   :  { %16 = vsyncpa [#allocation4 + $0x1], 0  ;;  %s1548_s18 = smov 0   ;;  %s1550_s19 = smov 0  }
   0x5   :  { %s1552_s20 = smov 0   ;;  %s1554_s21 = smov 0  }
   0x6 LB: > { %s1569_s22 = sadd.s32 4294967295, %s1507_s21   ;;  %s1056_s23 = sadd.s32 4294967294, %s1507_s21   ;;  %s1507_s21 = sphi %s1554_s21, %s1817_s21   ;;  %s1503_s20 = sphi %s1552_s20, %s1816_s20   ;;  %s1499_s19 = sphi %s1550_s19, %s1815_s19   ;;  %s1495_s18 = sphi %s1548_s18, %s1814_s18  }
   0x7   : > { %p42_p0 = scmp.ne.s32.totalorder %s1499_s19, %s1495_s18  ;;  %p1798_p1 = scmp.eq.s32.totalorder %s1569_s22, 0 }
   0x8   : > { %p156_p3 = scmp.eq.s32.totalorder %s1056_s23, 1  ;;  %p1057_p5 = scmp.ge.s32.totalorder %s1507_s21, 1 }
   0x9   : > { %p1578_p4 = por %p1798_p1, %p42_p0  ;;  %p163_p7 = scmp.lt.s32.totalorder %s1507_s21, 3 }
   0xa   : > { %p1583_p6 = por %p156_p3, %p42_p0  ;;  %s1509_s27 = smov [#allocation5]  }
   0xb   : > { %s1801_s24 = scalar_select %p1578_p4, 1, 0 }
   0xc   : > { %s1802_s25 = scalar_select %p1583_p6, 1, 0 }
   0xd   : > { %p1588_p8 = pnand %p1057_p5, %p163_p7  ;;  %s175_s28 = sshll.u32 %s1509_s27, 4  ;;  %s1592_s28 = int_to_ptr.vmem [resolvable:$true] %s175_s28 }
   0xe   : > { %s1510_s30 = smov [#allocation7]   ;;  %s1351_s9 = scalar_lea.hbm %s1793_s1, 4096 }
   0xf   : > { %p1193_p9 = pneg %p1588_p8  ;;  %s191_s6 = sshll.u32 %s1510_s30, 4  ;;  %s1603_s6 = int_to_ptr.vmem [resolvable:$true] %s191_s6 }
  0x10   : > { %p1352_p12 = scmp.ne.s32.totalorder %s1793_s1, %s1351_s9  ;;  %p1358_p5 = scmp.lt.u32.totalorder %s1351_s9, %s1793_s1 }
  0x11   : > { %p1599_p11 = pnand %p1193_p9, %p1798_p1 }
  0x13   : > { %p1353_p13 = pneg %p1599_p11 }
  0x15   : > { %p1354_p0 = pnand %p1353_p13, %p1352_p12 }
  0x17   : > { %p1355_p3 = pneg %p1354_p0 }
  0x19   : > { %p1360_p7 = pnand %p1358_p5, %p1355_p3 }
  0x1b   : > { %1363 = shalt.err (!%p1360_p7)
}
  0x1c   : > { %s1364_s14 = scalar_lea.vmem %s1592_s28, 4096  ;;  %p1372_p2 = scmp.lt.s32.totalorder %s1592_s28, %s1592_s28 }
  0x1d   : > { %p1365_p9 = scmp.ne.s32.totalorder %s1592_s28, %s1364_s14  ;;  %p1373_p12 = scmp.lt.s32.totalorder %s1364_s14, %s1364_s14 }
  0x1f   : > { %p1367_p10 = pnand %p1365_p9, %p1353_p13  ;;  %p1374_p0 = por %p1373_p12, %p1372_p2 }
  0x21   : > { %p1368_p1 = pneg %p1367_p10 }
  0x23   : > { %p1375_p6 = pnand %p1374_p0, %p1368_p1 }
  0x25   : > { %1378 = shalt.err (!%p1375_p6)
}
  0x26   : > { %s1511_s15 = smov 256   ;;  %s1512_s16 = smov 16  }
  0x27   : > { %1196 = dma.hbm_to_vmem [thread:$0]  (!%p1599_p11), %s1793_s1, 4096, %s1592_s28, [#allocation6], %s1511_s15, %s1511_s15, %s1512_s16  }
  0x28   : > { %s1379_s7 = scalar_lea.hbm %s1795_s3, 4096 }
  0x29   : > { %p1380_p2 = scmp.ne.s32.totalorder %s1795_s3, %s1379_s7  ;;  %p1386_p10 = scmp.lt.u32.totalorder %s1379_s7, %s1795_s3 }
  0x2b   : > { %p1382_p1 = pnand %p1380_p2, %p1353_p13 }
  0x2d   : > { %p1383_p6 = pneg %p1382_p1 }
  0x2f   : > { %p1388_p3 = pnand %p1386_p10, %p1383_p6 }
  0x31   : > { %1391 = shalt.err (!%p1388_p3)
}
  0x32   : > { %s1392_s28 = scalar_lea.vmem %s1603_s6, 4096  ;;  %p1400_p12 = scmp.lt.s32.totalorder %s1603_s6, %s1603_s6 }
  0x33   : > { %p1393_p5 = scmp.ne.s32.totalorder %s1603_s6, %s1392_s28  ;;  %p1401_p0 = scmp.lt.s32.totalorder %s1392_s28, %s1392_s28 }
  0x35   : > { %p1395_p7 = pnand %p1393_p5, %p1353_p13  ;;  %p1402_p2 = por %p1401_p0, %p1400_p12 }
  0x37   : > { %p1396_p9 = pneg %p1395_p7 }
  0x39   : > { %p1403_p1 = pnand %p1402_p2, %p1396_p9 }
  0x3b   : > { %1406 = shalt.err (!%p1403_p1)
}
  0x3c   : > { %s1513_s12 = smov 64   ;;  %s1514_s13 = smov 4  }
  0x3d   : > { %1199 = dma.hbm_to_vmem [thread:$0]  (!%p1599_p11), %s1795_s3, 4096, %s1603_s6, [#allocation6], %s1513_s12, %s1513_s12, %s1514_s13  }
  0x3e   : > { %s1658_s16 = sadd.s32 1, %s1507_s21   ;;  %s29_s23 = sadd.s32 1, %s1503_s20 }
  0x3f   : > { %s26_s17 = ssub.s32 %s1507_s21, %s1658_s16  ;;  %p36_p6 = scmp.ne.s32.totalorder %s1503_s20, %s1499_s19 }
  0x40   : > { %p27_p13 = scmp.eq.s32.totalorder %s26_s17, 0  ;;  %p37_p10 = scmp.eq.s32.totalorder %s1507_s21, 0 }
  0x41   : > { %p1805_p5 = scmp.eq.s32.totalorder %s1569_s22, 1  ;;  %p1210_p9 = scmp.lt.s32.totalorder %s1507_s21, 2 }
  0x42   : > { %s1667_s27 = scalar_select %p27_p13, %s1503_s20, %s29_s23  }
  0x43   : > { %p38_p3 = por %p37_p10, %p36_p6  ;;  %p1671_p7 = por %p1805_p5, %p36_p6 }
  0x44   : > { %s208_s29 = sand.u32 1, %s1503_s20   ;;  %s1062_s6 = sshll.u32 %s1507_s21, 7 }
  0x45   : > { %s1806_s30 = scalar_select %p1671_p7, 1, 0 }
  0x46   : > { %s1061_s7 = sshll.u32 %s208_s29, 3  ;;  %s1681_s10 = scalar_lea.hbm %s1792_s0, %s1062_s6 }
  0x47   : > { %s212_s11 = scalar_lea.vmem [#allocation2], %s1061_s7  ;;  %p1685_p11 = pnand %p1210_p9, %p38_p3 }
  0x48   : > { %s219_s28 = sshll.u32 %s212_s11, 4  ;;  %s209_s13 = scalar_lea.sflag [#allocation3], %s208_s29  ;;  %s1683_s28 = int_to_ptr.vmem [resolvable:$true] %s219_s28 }
  0x49   : > { %s1407_s14 = scalar_lea.hbm %s1681_s10, 128  ;;  %p1409_p0 = pneg %p1685_p11 }
  0x4a   : > { %p1408_p12 = scmp.ne.s32.totalorder %s1681_s10, %s1407_s14  ;;  %s1412_s23 = scalar_lea.hbm %s1792_s0, 256 }
  0x4b   : > { %p1413_p13 = scmp.lt.u32.totalorder %s1681_s10, %s1792_s0  ;;  %p1414_p6 = scmp.lt.u32.totalorder %s1412_s23, %s1407_s14 }
  0x4c   : > { %p1410_p2 = pnand %p1409_p0, %p1408_p12  ;;  %p1416_p3 = scmp.lt.u32.totalorder %s1407_s14, %s1681_s10 }
  0x4d   : > { %p1415_p10 = por %p1414_p6, %p1413_p13 }
  0x4e   : > { %p1411_p1 = pneg %p1410_p2 }
  0x4f   : > { %p1417_p5 = por %p1416_p3, %p1415_p10 }
  0x51   : > { %p1418_p9 = pnand %p1417_p5, %p1411_p1 }
  0x53   : > { %1421 = shalt.err (!%p1418_p9)
}
  0x54   : > { %s1422_s29 = scalar_lea.vmem %s1683_s28, 128  ;;  %s1515_s8 = smov [#allocation2]  }
  0x55   : > { %p1423_p12 = scmp.ne.s32.totalorder %s1683_s28, %s1422_s29  ;;  %s1427_s9 = sshll.u32 %s1515_s8, 4  ;;  %s1428_s9 = int_to_ptr.vmem [resolvable:$false] %s1427_s9 }
  0x56   : > { %s1429_s11 = scalar_lea.vmem %s1428_s9, 256  ;;  %p1430_p4 = scmp.lt.s32.totalorder %s1683_s28, %s1428_s9 }
  0x57   : > { %p1425_p2 = pnand %p1423_p12, %p1409_p0  ;;  %p1431_p13 = scmp.lt.s32.totalorder %s1429_s11, %s1422_s29 }
  0x59   : > { %p1426_p7 = pneg %p1425_p2  ;;  %p1432_p6 = por %p1431_p13, %p1430_p4 }
  0x5b   : > { %p1433_p10 = pnand %p1432_p6, %p1426_p7 }
  0x5d   : > { %1436 = shalt.err (!%p1433_p10)
}
  0x5e   : > { %1203 = dma.hbm_to_vmem [thread:$0]  (!%p1685_p11), %s1681_s10, 128, %s1683_s28, %s209_s13  }
  0x5f   : > { %228 = sbr.rel (%p1588_p8) target bundleno = 900 (0x384), region = 40  ;;  %s1717_s14 = sand.u32 (!%p1588_p8), 1, %s1499_s19  }
  0x60   : > { %s1064_s15 = sshll.u32 (!%p1588_p8), %s1717_s14, 3  ;;  %s231_s17 = scalar_lea.sflag (!%p1588_p8), [#allocation3], %s1717_s14 }
  0x61   : > { %s234_s23 = scalar_lea.vmem (!%p1588_p8), [#allocation2], %s1064_s15  ;;  %p1808_p4 = scmp.ne.s32.totalorder (!%p1588_p8), %s1801_s24, 0 }
  0x66   : > { %1482 = dma.done.wait (%p1808_p4), %s231_s17, 128  }
  0x67   : > { %1484 = vsyncadd (%p1808_p4), %s231_s17, 4294967168  ;;  %p1809_p7 = scmp.eq.s32.totalorder %s1569_s22, 0 }
  0x69   : > { %1486 = dma.done.wait (%p1809_p7), [#allocation6], 8192   ;;  %p1810_p8 = pmov %p1809_p7 }
  0x6a   : > { %v1731_v0 = vld [vmem:[%s234_s23] sm:$0xff]  ;;  %v1516_v35 = vmov 0   ;;  %v1301_v44 = vld [vmem:[#allocation7 + $0x40] sm:$0xff]   ;;  %v1305_v48 = vld [vmem:[#allocation7 + $0x48] sm:$0xff]   ;;  %s1134_s12 = sshll.u32 %s1569_s22, 7  ;;  %s268_s13 = scalar_lea.vmem [#allocation8], %s1064_s15 }
  0x6b   : > { %1488 = vsyncadd (%p1810_p8), [#allocation6], 4294959104  ;;  %271 = vadd.xlane.f32.xlu0 %v1731_v0  ;;  %v1253_v1 = vld [vmem:[#allocation5 + $0x4] ss:$16 sps:$4 sm:$0xff]   ;;  %v1255_v2 = vld [vmem:[#allocation5 + $0xc] ss:$16 sps:$4 sm:$0xff]   ;;  %530 = vmatprep.mubr.bf16.mxu0 %v1516_v35  ;;  %s1748_s8 = scalar_lea.hbm %s1797_s5, %s1134_s12 }
  0x6c   : > { %v1257_v3 = vld [vmem:[#allocation5] ss:$16 sps:$4 sm:$0xff]   ;;  %v1258_v4 = vld [vmem:[#allocation5 + $0x8] ss:$16 sps:$4 sm:$0xff]   ;;  %v1259_v5 = vld [vmem:[#allocation5 + $0x24] ss:$16 sps:$4 sm:$0xff]   ;;  %498 = vmatprep.subr.bf16.mxu0 %v1253_v1  ;;  %539 = vmatprep.subr.bf16.mxu1 %v1255_v2 }
  0x6d   : > { %v1261_v6 = vld [vmem:[#allocation5 + $0x2c] ss:$16 sps:$4 sm:$0xff]   ;;  %499 = vmatpush1.bf16.msra.mxu0 %v1257_v3  ;;  %540 = vmatpush1.bf16.msra.mxu1 %v1258_v4  ;;  %v1263_v7 = vld [vmem:[#allocation5 + $0x20] ss:$16 sps:$4 sm:$0xff]   ;;  %v1264_v8 = vld [vmem:[#allocation5 + $0x28] ss:$16 sps:$4 sm:$0xff]  }
  0x6e   : > { %500 = vmatprep.subr.bf16.mxu0 %v1259_v5  ;;  %541 = vmatprep.subr.bf16.mxu1 %v1261_v6  ;;  %v1265_v9 = vld [vmem:[#allocation5 + $0x44] ss:$16 sps:$4 sm:$0xff]   ;;  %v1267_v10 = vld [vmem:[#allocation5 + $0x4c] ss:$16 sps:$4 sm:$0xff]   ;;  %v1269_v11 = vld [vmem:[#allocation5 + $0x40] ss:$16 sps:$4 sm:$0xff]  }
  0x6f   : > { %v1270_v12 = vld [vmem:[#allocation5 + $0x48] ss:$16 sps:$4 sm:$0xff]   ;;  %v1271_v13 = vld [vmem:[#allocation5 + $0x64] ss:$16 sps:$4 sm:$0xff]   ;;  %v1273_v14 = vld [vmem:[#allocation5 + $0x6c] ss:$16 sps:$4 sm:$0xff]   ;;  %571 = vmatprep.mubr.bf16.mxu1 %v1516_v35 }
  0x70   : > { %v1275_v19 = vld [vmem:[#allocation5 + $0x60] ss:$16 sps:$4 sm:$0xff]   ;;  %v1276_v20 = vld [vmem:[#allocation5 + $0x68] ss:$16 sps:$4 sm:$0xff]   ;;  %v1277_v21 = vld [vmem:[#allocation5 + $0x84] ss:$16 sps:$4 sm:$0xff]  }
  0x71   : > { %501 = vmatpush1.bf16.msra.mxu0 %v1263_v7  ;;  %542 = vmatpush1.bf16.msra.mxu1 %v1264_v8  ;;  %v1279_v22 = vld [vmem:[#allocation5 + $0x8c] ss:$16 sps:$4 sm:$0xff]   ;;  %v1281_v23 = vld [vmem:[#allocation5 + $0x80] ss:$16 sps:$4 sm:$0xff]   ;;  %v1282_v24 = vld [vmem:[#allocation5 + $0x88] ss:$16 sps:$4 sm:$0xff]  }
  0x72   : > { %502 = vmatprep.subr.bf16.mxu0 %v1265_v9  ;;  %543 = vmatprep.subr.bf16.mxu1 %v1267_v10  ;;  %v1283_v25 = vld [vmem:[#allocation5 + $0xa4] ss:$16 sps:$4 sm:$0xff]   ;;  %v1285_v26 = vld [vmem:[#allocation5 + $0xac] ss:$16 sps:$4 sm:$0xff]   ;;  %v1287_v27 = vld [vmem:[#allocation5 + $0xa0] ss:$16 sps:$4 sm:$0xff]  }
  0x73   : > { %v1288_v28 = vld [vmem:[#allocation5 + $0xa8] ss:$16 sps:$4 sm:$0xff]   ;;  %v1289_v29 = vld [vmem:[#allocation5 + $0xc4] ss:$16 sps:$4 sm:$0xff]   ;;  %v1291_v30 = vld [vmem:[#allocation5 + $0xcc] ss:$16 sps:$4 sm:$0xff]  }
  0x74   : > { %v1293_v31 = vld [vmem:[#allocation5 + $0xc0] ss:$16 sps:$4 sm:$0xff]   ;;  %v1294_v32 = vld [vmem:[#allocation5 + $0xc8] ss:$16 sps:$4 sm:$0xff]   ;;  %v1295_v33 = vld [vmem:[#allocation5 + $0xe4] ss:$16 sps:$4 sm:$0xff]  }
  0x75   : > { %503 = vmatpush1.bf16.msra.mxu0 %v1269_v11  ;;  %544 = vmatpush1.bf16.msra.mxu1 %v1270_v12  ;;  %v1297_v34 = vld [vmem:[#allocation5 + $0xec] ss:$16 sps:$4 sm:$0xff]   ;;  %v1299_v36 = vld [vmem:[#allocation5 + $0xe0] ss:$16 sps:$4 sm:$0xff]   ;;  %v1300_v37 = vld [vmem:[#allocation5 + $0xe8] ss:$16 sps:$4 sm:$0xff]  }
  0x76   : > { %504 = vmatprep.subr.bf16.mxu0 %v1271_v13  ;;  %545 = vmatprep.subr.bf16.mxu1 %v1273_v14  ;;  %v1302_v45 = vld [vmem:[#allocation7 + $0xc0] sm:$0xff]   ;;  %v1306_v49 = vld [vmem:[#allocation7 + $0xc8] sm:$0xff]   ;;  %v1309_v52 = vld [vmem:[#allocation7 + $0x50] sm:$0xff]   ;;  %v318_v13 = vlaneseq  ;;  %s967_s7 = sshll.u32 %s268_s13, 4  ;;  %s954_s9 = scalar_lea.sflag [#allocation4], %s1717_s14  ;;  %s1750_s7 = int_to_ptr.vmem [resolvable:$true] %s967_s7 }
  0x77   : > { %v1303_v46 = vld [vmem:[#allocation7] sm:$0xff]   ;;  %v1307_v50 = vld [vmem:[#allocation7 + $0x8] sm:$0xff]   ;;  %v1310_v53 = vld [vmem:[#allocation7 + $0xd0] sm:$0xff]   ;;  %s1437_s11 = scalar_lea.vmem %s1750_s7, 128  ;;  %p1811_p0 = scmp.ne.s32.totalorder %s1806_s30, 0 }
  0x78   : > { %v1304_v47 = vld [vmem:[#allocation7 + $0x80] sm:$0xff]   ;;  %v1308_v51 = vld [vmem:[#allocation7 + $0x88] sm:$0xff]   ;;  %v1311_v54 = vld [vmem:[#allocation7 + $0x10] sm:$0xff]   ;;  %v319_v14 = vshrl.u32 %v318_v13, 7  ;;  %p1438_p11 = scmp.ne.s32.totalorder %s1750_s7, %s1437_s11  ;;  %s1517_s22 = smov [#allocation8]  }
  0x79   : > { %505 = vmatpush1.bf16.msra.mxu0 %v1275_v19  ;;  %546 = vmatpush1.bf16.msra.mxu1 %v1276_v20  ;;  %v1312_v55 = vld [vmem:[#allocation7 + $0x90] sm:$0xff]   ;;  %v1313_v56 = vld [vmem:[#allocation7 + $0x58] sm:$0xff]   ;;  %v1317_v60 = vld [vmem:[#allocation7 + $0x60] sm:$0xff]   ;;  %s1441_s15 = sshll.u32 %s1517_s22, 4  ;;  %s1442_s15 = int_to_ptr.vmem [resolvable:$false] %s1441_s15 }
  0x7a   : > { %506 = vmatprep.subr.bf16.mxu0 %v1277_v21  ;;  %547 = vmatprep.subr.bf16.mxu1 %v1279_v22  ;;  %v1314_v57 = vld [vmem:[#allocation7 + $0xd8] sm:$0xff]   ;;  %v1318_v61 = vld [vmem:[#allocation7 + $0xe0] sm:$0xff]   ;;  %v1321_v1 = vld [vmem:[#allocation7 + $0x68] sm:$0xff]   ;;  %v332_v19 = vsub.s32 3, %v319_v14  ;;  %p1439_p1 = pnand %p1438_p11, %p1811_p0  ;;  %s1443_s17 = scalar_lea.vmem %s1442_s15, 256 }
  0x7b   : > { %v1315_v58 = vld [vmem:[#allocation7 + $0x18] sm:$0xff]   ;;  %v1319_v62 = vld [vmem:[#allocation7 + $0x20] sm:$0xff]   ;;  %v1322_v2 = vld [vmem:[#allocation7 + $0xe8] sm:$0xff]   ;;  %p1444_p5 = scmp.lt.s32.totalorder %s1750_s7, %s1442_s15  ;;  %p1445_p9 = scmp.lt.s32.totalorder %s1443_s17, %s1437_s11 }
  0x7c   : > { %v1316_v59 = vld [vmem:[#allocation7 + $0x98] sm:$0xff]   ;;  %v1320_v63 = vld [vmem:[#allocation7 + $0xa0] sm:$0xff]   ;;  %v1323_v3 = vld [vmem:[#allocation7 + $0x28] sm:$0xff]   ;;  %p1440_p3 = pneg %p1439_p1 }
  0x7d   : > { %507 = vmatpush1.bf16.msra.mxu0 %v1281_v23  ;;  %548 = vmatpush1.bf16.msra.mxu1 %v1282_v24  ;;  %v1324_v4 = vld [vmem:[#allocation7 + $0xa8] sm:$0xff]   ;;  %v1325_v5 = vld [vmem:[#allocation7 + $0x70] sm:$0xff]   ;;  %v1329_v9 = vld [vmem:[#allocation7 + $0x78] sm:$0xff]   ;;  %p1446_p12 = por %p1445_p9, %p1444_p5 }
  0x7e   : > { %508 = vmatprep.subr.bf16.mxu0 %v1283_v25  ;;  %549 = vmatprep.subr.bf16.mxu1 %v1285_v26  ;;  %v1326_v6 = vld [vmem:[#allocation7 + $0xf0] sm:$0xff]   ;;  %v1330_v10 = vld [vmem:[#allocation7 + $0xf8] sm:$0xff]  }
  0x7f   : > { %v1327_v7 = vld [vmem:[#allocation7 + $0x30] sm:$0xff]   ;;  %v1331_v11 = vld [vmem:[#allocation7 + $0x38] sm:$0xff]   ;;  %p1447_p2 = pnand %p1446_p12, %p1440_p3 }
  0x80   : > { %v1328_v8 = vld [vmem:[#allocation7 + $0xb0] sm:$0xff]   ;;  %v1332_v12 = vld [vmem:[#allocation7 + $0xb8] sm:$0xff]  }
  0x81   : > { %509 = vmatpush1.bf16.msra.mxu0 %v1287_v27  ;;  %550 = vmatpush1.bf16.msra.mxu1 %v1288_v28 }
  0x82   : > { %510 = vmatprep.subr.bf16.mxu0 %v1289_v29  ;;  %551 = vmatprep.subr.bf16.mxu1 %v1291_v30 }
  0x85   : > { %511 = vmatpush1.bf16.msra.mxu0 %v1293_v31  ;;  %552 = vmatpush1.bf16.msra.mxu1 %v1294_v32 }
  0x86   : > { %512 = vmatprep.subr.bf16.mxu0 %v1295_v33  ;;  %553 = vmatprep.subr.bf16.mxu1 %v1297_v34 }
  0x89   : > { %513 = vmatpush1.bf16.msra.mxu0 %v1299_v36  ;;  %554 = vmatpush1.bf16.msra.mxu1 %v1300_v37 }
  0x8a   : > { %1137 = vmatprep.subr.bf16.mxu0 %v1301_v44  ;;  %1159 = vmatprep.subr.bf16.mxu1 %v1302_v45 }
  0xf8   : > { %v272_v15 = vpop.xlane.xlu0 %271 }
  0xf9   : > { %v274_v16 = vmul.f32 0.0078125, %v272_v15  ;;  %v320_v15 = vsub.s32 0, %v319_v14 }
  0xfb   : > { %v275_v17 = vsub.f32 %v1731_v0, %v274_v16  ;;  %v328_v16 = vsub.s32 2, %v319_v14 }
  0xfd   : > { %v276_v18 = vmul.f32 %v275_v17, %v275_v17 }
  0xff   : > { %277 = vadd.xlane.f32.xlu0 %v276_v18  ;;  %v324_v18 = vsub.s32 1, %v319_v14 }
 0x18c   : > { %v278_v38 = vpop.xlane.xlu0 %277 }
 0x18d   : > { %v279_v39 = vmul.f32 0.0078125, %v278_v38 }
 0x18f   : > { %v280_v40 = vadd.f32 1e-05, %v279_v39 }
 0x191   : > { %1333 = vrsqrt.f32 %v280_v40 }
 0x19b   : > { %v1334_v41 = vpop.eup %1333 }
 0x19c   : > { %v282_v42 = vmul.f32 %v1334_v41, %v275_v17  ;;  %v316_v17 = vld [vmem:[%s1794_s2] sm:$0xf] }
 0x19d   : > { %v321_v20 = vrot.slane %v316_v17, %v320_v15  ;;  %v329_v21 = vrot.slane %v316_v17, %v328_v16  ;;  %v325_v22 = vrot.slane %v316_v17, %v324_v18  ;;  %v333_v23 = vrot.slane %v316_v17, %v332_v19 }
 0x19e   : > { %v283_v43 = vpack.c.bf16 %v282_v42, %v282_v42 }
 0x1a0   : > { %531 = vmatmul.mubr.bf16.vlgmr.msra.gmra.mrb[0].mxu0 %v283_v43  ;;  %572 = vmatmul.mubr.bf16.vlgmr.msra.gmra.mrb[0].mxu1 %v283_v43 }
 0x1a1   : > { %1138 = vmatpush3.bf16.msra.mxu0 %v1303_v46  ;;  %1160 = vmatpush3.bf16.msra.mxu1 %v1304_v47 }
 0x1a2   : > { %1139 = vmatprep.subr.bf16.mxu0 %v1305_v48  ;;  %1161 = vmatprep.subr.bf16.mxu1 %v1306_v49 }
 0x1a5   : > { %1140 = vmatpush3.bf16.msra.mxu0 %v1307_v50  ;;  %1162 = vmatpush3.bf16.msra.mxu1 %v1308_v51 }
 0x1a6   : > { %1141 = vmatprep.subr.bf16.mxu0 %v1309_v52  ;;  %1163 = vmatprep.subr.bf16.mxu1 %v1310_v53 }
 0x1a9   : > { %1142 = vmatpush3.bf16.msra.mxu0 %v1311_v54  ;;  %1164 = vmatpush3.bf16.msra.mxu1 %v1312_v55 }
 0x1aa   : > { %1143 = vmatprep.subr.bf16.mxu0 %v1313_v56  ;;  %1165 = vmatprep.subr.bf16.mxu1 %v1314_v57 }
 0x1ad   : > { %1144 = vmatpush3.bf16.msra.mxu0 %v1315_v58  ;;  %1166 = vmatpush3.bf16.msra.mxu1 %v1316_v59 }
 0x1ae   : > { %1145 = vmatprep.subr.bf16.mxu0 %v1317_v60  ;;  %1167 = vmatprep.subr.bf16.mxu1 %v1318_v61 }
 0x1b1   : > { %1146 = vmatpush3.bf16.msra.mxu0 %v1319_v62  ;;  %1168 = vmatpush3.bf16.msra.mxu1 %v1320_v63 }
 0x1b2   : > { %1147 = vmatprep.subr.bf16.mxu0 %v1321_v1  ;;  %1169 = vmatprep.subr.bf16.mxu1 %v1322_v2 }
 0x1b5   : > { %1148 = vmatpush3.bf16.msra.mxu0 %v1323_v3  ;;  %1170 = vmatpush3.bf16.msra.mxu1 %v1324_v4  ;;  %v1100_v3 = vld [vmem:[%s1796_s4] ss:$0 sm:$0xff] }
 0x1b6   : > { %1149 = vmatprep.subr.bf16.mxu0 %v1325_v5  ;;  %1171 = vmatprep.subr.bf16.mxu1 %v1326_v6 }
 0x1b9   : > { %1150 = vmatpush3.bf16.msra.mxu0 %v1327_v7  ;;  %1172 = vmatpush3.bf16.msra.mxu1 %v1328_v8 }
 0x1ba   : > { %1151 = vmatprep.subr.bf16.mxu0 %v1329_v9  ;;  %1173 = vmatprep.subr.bf16.mxu1 %v1330_v10 }
 0x1bd   : > { %1152 = vmatpush3.bf16.msra.mxu0 %v1331_v11  ;;  %1174 = vmatpush3.bf16.msra.mxu1 %v1332_v12 }
 0x273   : > { %v532_v24 = vpop.f32.mrb[0].mxu0  ;;  %v573_v25 = vpop.f32.mrb[0].mxu1 }
 0x274   : > { %v533_v26 = vadd.f32 %v532_v24, %v321_v20  ;;  %v574_v27 = vadd.f32 %v573_v25, %v329_v21  ;;  %v534_v28 = vpop.f32.mrb[1].mxu0  ;;  %v575_v29 = vpop.f32.mrb[1].mxu1 }
 0x275   : > { %v535_v30 = vadd.f32 %v534_v28, %v325_v22  ;;  %v576_v31 = vadd.f32 %v575_v29, %v333_v23  ;;  %v536_v32 = vpop.f32.mrb[2].mxu0  ;;  %v577_v33 = vpop.f32.mrb[2].mxu1 }
 0x276   : > { %v580_v34 = vsub.f32 0.0, %v533_v26  ;;  %v582_v35 = vsub.f32 0.0, %v574_v27  ;;  %v537_v36 = vpop.f32.mrb[3].mxu0  ;;  %v578_v37 = vpop.f32.mrb[3].mxu1 }
 0x277   : > { %v581_v38 = vsub.f32 0.0, %v535_v30  ;;  %v583_v39 = vsub.f32 0.0, %v576_v31 }
 0x278   : > { %v584_v40 = vmul.f32 1.442695, %v580_v34  ;;  %v588_v41 = vmul.f32 1.442695, %v582_v35 }
 0x279   : > { %v586_v42 = vmul.f32 1.442695, %v581_v38  ;;  %v590_v43 = vmul.f32 1.442695, %v583_v39 }
 0x27a   : > { %1335 = vpow2.f32 %v584_v40 }
 0x27b   : > { %1337 = vpow2.f32 %v588_v41 }
 0x27c   : > { %1339 = vpow2.f32 %v586_v42 }
 0x27d   : > { %1341 = vpow2.f32 %v590_v43 }
 0x284   : > { %v1336_v44 = vpop.eup %1335 }
 0x285   : > { %v1338_v45 = vpop.eup %1337  ;;  %v592_v46 = vadd.f32 1.0, %v1336_v44 }
 0x286   : > { %v1340_v47 = vpop.eup %1339  ;;  %v594_v48 = vadd.f32 1.0, %v1338_v45 }
 0x287   : > { %v1342_v49 = vpop.eup %1341  ;;  %1343 = vrcp.f32 %v592_v46  ;;  %v593_v50 = vadd.f32 1.0, %v1340_v47 }
 0x288   : > { %1345 = vrcp.f32 %v594_v48  ;;  %v595_v51 = vadd.f32 1.0, %v1342_v49 }
 0x289   : > { %1347 = vrcp.f32 %v593_v50 }
 0x28a   : > { %1349 = vrcp.f32 %v595_v51 }
 0x291   : > { %v1344_v52 = vpop.eup %1343 }
 0x292   : > { %v1346_v53 = vpop.eup %1345  ;;  %v600_v55 = vmul.f32 %v1344_v52, %v533_v26 }
 0x293   : > { %v1348_v54 = vpop.eup %1347  ;;  %v602_v57 = vmul.f32 %v1346_v53, %v574_v27 }
 0x294   : > { %v1350_v56 = vpop.eup %1349  ;;  %v601_v58 = vmul.f32 %v1348_v54, %v535_v30  ;;  %v604_v61 = vpack.c.bf16 %v600_v55, %v600_v55 }
 0x295   : > { %v603_v59 = vmul.f32 %v1350_v56, %v576_v31  ;;  %v606_v63 = vpack.c.bf16 %v602_v57, %v602_v57 }
 0x296   : > { %v605_v60 = vpack.c.bf16 %v601_v58, %v601_v58 }
 0x297   : > { %v607_v62 = vpack.c.bf16 %v603_v59, %v603_v59 }
 0x298   : > { %903 = vmatprep.mubr.bf16.mxu0 %v605_v60 }
 0x299   : > { %943 = vmatprep.mubr.bf16.mxu1 %v607_v62  ;;  %904 = vmatmul.mubr.bf16.vlgmr.msra.gmra.mrb[4].mxu0 %v604_v61 }
 0x29a   : > { %944 = vmatmul.mubr.bf16.vlgmr.msra.gmra.mrb[4].mxu1 %v606_v63 }
 0x36c   : > { %v1153_v1 = vpop.f32.mrb[4].mxu0 }
 0x36d   : > { %v1175_v2 = vpop.f32.mrb[4].mxu1  ;;  %v1154_v4 = vpop.f32.mrb[5].mxu0 }
 0x36e   : > { %v1155_v5 = vadd.f32 %v1154_v4, %v1153_v1  ;;  %v1176_v6 = vpop.f32.mrb[5].mxu1  ;;  %v1156_v7 = vpop.f32.mrb[6].mxu0 }
 0x36f   : > { %v1177_v8 = vadd.f32 %v1176_v6, %v1175_v2  ;;  %v1178_v9 = vpop.f32.mrb[6].mxu1  ;;  %v1157_v10 = vpop.f32.mrb[7].mxu0 }
 0x370   : > { %v906_v11 = vadd.f32 %v1155_v5, %v1100_v3  ;;  %v1179_v12 = vpop.f32.mrb[7].mxu1 }
 0x372   : > { %v946_v13 = vadd.f32 %v1177_v8, %v906_v11 }
 0x374   : > { %v951_v14 = vadd.f32 %v946_v13, %v1731_v0 }
 0x376   : > { %952 = vst [vmem:[%s268_s13] sm:$0xff] %v951_v14 }
 0x377   : > { %1450 = shalt.err (!%p1447_p2)
}
 0x378   : > { %s1451_s14 = scalar_lea.hbm %s1748_s8, 128  ;;  %s1455_s26 = scalar_lea.hbm %s1797_s5, 256 }
 0x379   : > { %p1452_p13 = scmp.ne.s32.totalorder %s1748_s8, %s1451_s14  ;;  %p1456_p4 = scmp.lt.u32.totalorder %s1748_s8, %s1797_s5 }
 0x37a   : > { %p1457_p7 = scmp.lt.u32.totalorder %s1455_s26, %s1451_s14  ;;  %p1459_p11 = scmp.lt.u32.totalorder %s1451_s14, %s1748_s8 }
 0x37b   : > { %p1453_p6 = pnand %p1452_p13, %p1811_p0 }
 0x37c   : > { %p1458_p8 = por %p1457_p7, %p1456_p4 }
 0x37d   : > { %p1454_p10 = pneg %p1453_p6 }
 0x37e   : > { %p1460_p1 = por %p1459_p11, %p1458_p8 }
 0x380   : > { %p1461_p3 = pnand %p1460_p1, %p1454_p10 }
 0x382   : > { %1464 = shalt.err (!%p1461_p3)
}
 0x383   : > { %1191 = dma.vmem_to_hbm [thread:$0]  (%p1811_p0), %s1750_s7, 128, %s1748_s8, %s954_s9  }
 0x384 PF: > { %s979_s12 = sand.u32 1, %s1495_s18   ;;  %p1812_p5 = scmp.ne.s32.totalorder %s1802_s25, 0 }
 0x385   : > { %p1813_p9 = scmp.ge.s32.totalorder %s1507_s21, 2  ;;  %s980_s13 = scalar_lea.sflag [#allocation4], %s979_s12 }
 0x387   : > { %p1205_p12 = pnand %p1813_p9, %p1812_p5 }
 0x389   : > { %1490 = dma.done.wait (!%p1205_p12), %s980_s13, 128  }
 0x38a   : > { %1492 = vsyncadd (!%p1205_p12), %s980_s13, 4294967168  ;;  %p19_p2 = scmp.ge.s32.totalorder %s1658_s16, 4   ;;  %s1814_s18 = smov %s1499_s19 }
 0x38b   : > { %s1815_s19 = smov %s1503_s20  ;;  %s1816_s20 = smov %s1667_s27 }
 0x38c   : > { %s1817_s21 = smov %s1658_s16  ;;  %21 = sbr.rel (!%p19_p2) target bundleno = 6 (0x6), region = 93 }
 0x393   :  { %985 = vsyncpa [#allocation3], 1 }
 0x394   :  { %987 = vsyncpa [#allocation3 + $0x1], 1 }
 0x395   :  { %988 = vsyncpa [#allocation6], 1 }
 0x396   :  { %989 = vsyncpa [#allocation4], 1 }
 0x397   :  { %991 = vsyncpa [#allocation4 + $0x1], 1 }

</bundles_post_ra>
